<compile_context>
chip_gen: v7x
topology: tpu7x:2x2x1
jax: 0.10.0
libtpu: 0.0.40
codegen_flags: <defaults>
</compile_context>

<pallas_src>
import jax
import jax.numpy as jnp
from jax.experimental import pallas as pl
from jax.experimental.pallas import tpu as pltpu


def _cdiv(a, b):
    return (a + b - 1) // b


def _round_up(x, m):
    return ((x + m - 1) // m) * m


def _mlp_kernel(x_ref, w1_ref, b1_ref, w2_ref, b2_ref, o_ref):
    # fc1 on the MXU (f32 operands, f32 accumulation); bias + ReLU on the VPU.
    h = jnp.dot(x_ref[...], w1_ref[...], preferred_element_type=jnp.float32)
    h = jnp.maximum(h + b1_ref[...], 0.0)
    # fc2 straight to the unpadded n_classes-wide logits (Mosaic pads lanes internally).
    logits = jnp.dot(h, w2_ref[...], preferred_element_type=jnp.float32) + b2_ref[...]
    # Numerically stable log-softmax: row max/sum go to the XLU, exp/log to the EUP --
    # both free slots relative to the DMA/writeback path that binds this kernel.
    m = jnp.max(logits, axis=-1, keepdims=True)
    shifted = logits - m
    lse = jnp.log(jnp.sum(jnp.exp(shifted), axis=-1, keepdims=True))
    o_ref[...] = shifted - lse


def net_forward(x, w1, b1, w2, b2, n_inputs, *, tile_b=2048):
    """Net.forward: log_softmax(relu(x.view(-1, n_inputs) @ w1 + b1) @ w2 + b2)."""
    x2d = x.reshape(-1, n_inputs)          # == x.view(-1, input_size); stays f32 in HBM
    B = x2d.shape[0]
    n_hidden = w1.shape[1]
    n_classes = w2.shape[1]

    # --- batch tiling ---------------------------------------------------------
    #  * big tiles amortize per-grid-step overhead
    #  * keep >= ~8 grid steps when the batch allows it (megacore + pipeline depth)
    #  * tile rows are a multiple of 8 (sublane); padding is at most num_tiles*8 rows
    #    and is skipped entirely when B already lines up (no extra HBM pass)
    max_tiles = _cdiv(B, 8)
    num_tiles = min(max(_cdiv(B, tile_b), min(8, max_tiles)), max_tiles)
    tile_rows = _round_up(_cdiv(B, num_tiles), 8)
    Bp = num_tiles * tile_rows
    if Bp != B:
        # zero rows -> log-softmax of the bias; harmless, sliced off on return
        x2d = jnp.pad(x2d, ((0, Bp - B), (0, 0)))

    b1_in = b1.reshape(1, n_hidden).astype(jnp.float32)
    b2_in = b2.reshape(1, n_classes).astype(jnp.float32)

    cost = pl.CostEstimate(
        flops=2 * Bp * n_inputs * n_hidden + 2 * Bp * n_hidden * n_classes,
        transcendentals=Bp * n_classes + Bp,
        bytes_accessed=(Bp * n_inputs * 4                                   # x in
                        + (n_inputs * n_hidden + n_hidden * n_classes) * 4  # weights
                        + (n_hidden + n_classes) * 4                        # biases
                        + Bp * n_classes * 4),                              # out (unpadded)
    )

    out = pl.pallas_call(
        _mlp_kernel,
        out_shape=jax.ShapeDtypeStruct((Bp, n_classes), jnp.float32),
        grid=(num_tiles,),
        in_specs=[
            pl.BlockSpec((tile_rows, n_inputs), lambda i: (i, 0)),   # x: tiled over batch
            pl.BlockSpec((n_inputs, n_hidden), lambda i: (0, 0)),    # w1: VMEM-resident
            pl.BlockSpec((1, n_hidden), lambda i: (0, 0)),           # b1: VMEM-resident
            pl.BlockSpec((n_hidden, n_classes), lambda i: (0, 0)),   # w2: VMEM-resident
            pl.BlockSpec((1, n_classes), lambda i: (0, 0)),          # b2: VMEM-resident
        ],
        # Unpadded lane width (= full last dim of the output array): legal per the
        # (8,128) rule and 12.8x less HBM writeback than a 128-lane padded slab.
        # NOTE(v5e): if the store DMA shows up exposed, add pipeline_mode=pl.Buffered(3).
        out_specs=pl.BlockSpec((tile_rows, n_classes), lambda i: (i, 0)),
        compiler_params=pltpu.CompilerParams(
            dimension_semantics=("parallel",),     # shard batch grid across TCs (v7x)
            vmem_limit_bytes=32 * 1024 * 1024,     # headroom for large tiles; safe on v5e/v6e/v7x
        ),
        cost_estimate=cost,
    )(x2d.astype(jnp.float32), w1.astype(jnp.float32), b1_in,
      w2.astype(jnp.float32), b2_in)

    return out if Bp == B else out[:B]


if __name__ == "__main__":
    n_inputs, n_hidden, n_classes = 32, 32, 10
    batch = 24

    key = jax.random.PRNGKey(0)
    kx, k1, k2, k3, k4 = jax.random.split(key, 5)

    # deterministic parameter init (PyTorch nn.Linear-style uniform bounds)
    bound1 = 1.0 / (n_inputs ** 0.5)
    bound2 = 1.0 / (n_hidden ** 0.5)
    w1 = jax.random.uniform(k1, (n_inputs, n_hidden), jnp.float32, -bound1, bound1)
    b1 = jax.random.uniform(k2, (n_hidden,), jnp.float32, -bound1, bound1)
    w2 = jax.random.uniform(k3, (n_hidden, n_classes), jnp.float32, -bound2, bound2)
    b2 = jax.random.uniform(k4, (n_classes,), jnp.float32, -bound2, bound2)

    x = jax.random.normal(kx, (batch, n_inputs), jnp.float32)

    # With batch=24 the tiling logic picks tile_rows=8, grid=(3,), Bp=B (no padding),
    # so this also exercises a multi-step pipelined run at toy size.
    out = net_forward(x, w1, b1, w2, b2, n_inputs)
    out = jax.block_until_ready(out)
    assert out.shape == (batch, n_classes)

    # Pure-JAX f32 reference (same math as the PyTorch forward).
    x2d = x.reshape(-1, n_inputs)
    ref = jax.nn.log_softmax(jnp.maximum(x2d @ w1 + b1, 0.0) @ w2 + b2, axis=1)
    assert jnp.allclose(out, ref, atol=2e-2, rtol=2e-2), (
        "mismatch vs f32 reference: max abs diff "
        f"{float(jnp.max(jnp.abs(out - ref)))}")

    print("KERNEL_OK")
</pallas_src>

<mosaic_0001>
module attributes {stable_mosaic.version = 11 : i64} {
  func.func @_mlp_kernel(%arg0: i32, %arg1: memref<8x32xf32, #tpu.memory_space<vmem>>, %arg2: memref<32x32xf32, #tpu.memory_space<vmem>>, %arg3: memref<1x32xf32, #tpu.memory_space<vmem>>, %arg4: memref<32x10xf32, #tpu.memory_space<vmem>>, %arg5: memref<1x10xf32, #tpu.memory_space<vmem>>, %arg6: memref<8x10xf32, #tpu.memory_space<vmem>>) attributes {dimension_semantics = [#tpu.dimension_semantics<parallel>], iteration_bounds = array<i64: 3>, scalar_prefetch = 0 : i64, scratch_operands = 0 : i64, tpu.core_type = #tpu.core_type<tc>, window_params = [{transform_indices = @transform_0, window_bounds = array<i64: 8, 32>}, {pipeline_mode = #tpu.pipeline_mode<synchronous>, transform_indices = @transform_1, window_bounds = array<i64: 32, 32>}, {pipeline_mode = #tpu.pipeline_mode<synchronous>, transform_indices = @transform_2, window_bounds = array<i64: 1, 32>}, {pipeline_mode = #tpu.pipeline_mode<synchronous>, transform_indices = @transform_3, window_bounds = array<i64: 32, 10>}, {pipeline_mode = #tpu.pipeline_mode<synchronous>, transform_indices = @transform_4, window_bounds = array<i64: 1, 10>}, {transform_indices = @transform_5, window_bounds = array<i64: 8, 10>}]} {
    %c0 = arith.constant 0 : index
    %c0_0 = arith.constant 0 : index
    %0 = vector.load %arg1[%c0, %c0_0] : memref<8x32xf32, #tpu.memory_space<vmem>>, vector<8x32xf32>
    %c0_1 = arith.constant 0 : index
    %c0_2 = arith.constant 0 : index
    %1 = vector.load %arg2[%c0_1, %c0_2] : memref<32x32xf32, #tpu.memory_space<vmem>>, vector<32x32xf32>
    %cst = arith.constant dense<0.000000e+00> : vector<8x32xf32>
    %2 = tpu.matmul %0, %1, %cst {dimension_numbers = #tpu.dot_dimension_numbers<[1], [0], [0], [1], [0, 0, 1, 1], [], []>} : vector<8x32xf32>, vector<32x32xf32>, vector<8x32xf32> -> vector<8x32xf32>
    %c0_3 = arith.constant 0 : index
    %c0_4 = arith.constant 0 : index
    %3 = vector.load %arg3[%c0_3, %c0_4] : memref<1x32xf32, #tpu.memory_space<vmem>>, vector<1x32xf32>
    %4 = vector.broadcast %3 : vector<1x32xf32> to vector<8x32xf32>
    %5 = arith.addf %2, %4 : vector<8x32xf32>
    %cst_5 = arith.constant 0.000000e+00 : f32
    %6 = vector.broadcast %cst_5 : f32 to vector<8x32xf32>
    %7 = arith.maximumf %5, %6 : vector<8x32xf32>
    %c0_6 = arith.constant 0 : index
    %c0_7 = arith.constant 0 : index
    %8 = vector.load %arg4[%c0_6, %c0_7] : memref<32x10xf32, #tpu.memory_space<vmem>>, vector<32x10xf32>
    %cst_8 = arith.constant dense<0.000000e+00> : vector<8x10xf32>
    %9 = tpu.matmul %7, %8, %cst_8 {dimension_numbers = #tpu.dot_dimension_numbers<[1], [0], [0], [1], [0, 0, 1, 1], [], []>} : vector<8x32xf32>, vector<32x10xf32>, vector<8x10xf32> -> vector<8x10xf32>
    %c0_9 = arith.constant 0 : index
    %c0_10 = arith.constant 0 : index
    %10 = vector.load %arg5[%c0_9, %c0_10] : memref<1x10xf32, #tpu.memory_space<vmem>>, vector<1x10xf32>
    %11 = vector.broadcast %10 : vector<1x10xf32> to vector<8x10xf32>
    %12 = arith.addf %9, %11 : vector<8x10xf32>
    %cst_11 = arith.constant dense<0xFF800000> : vector<8xf32>
    %13 = vector.multi_reduction <maximumf>, %12, %cst_11 [1] : vector<8x10xf32> to vector<8xf32>
    %14 = vector.shape_cast %13 : vector<8xf32> to vector<8x1xf32>
    %15 = vector.broadcast %14 : vector<8x1xf32> to vector<8x10xf32>
    %16 = arith.subf %12, %15 : vector<8x10xf32>
    %17 = math.exp %16 : vector<8x10xf32>
    %cst_12 = arith.constant dense<0.000000e+00> : vector<8xf32>
    %18 = vector.multi_reduction <add>, %17, %cst_12 [1] : vector<8x10xf32> to vector<8xf32>
    %19 = vector.shape_cast %18 : vector<8xf32> to vector<8x1xf32>
    %20 = math.log %19 : vector<8x1xf32>
    %21 = vector.broadcast %20 : vector<8x1xf32> to vector<8x10xf32>
    %22 = arith.subf %16, %21 : vector<8x10xf32>
    %c0_13 = arith.constant 0 : index
    %c0_14 = arith.constant 0 : index
    %23 = vector.load %arg6[%c0_13, %c0_14] : memref<8x10xf32, #tpu.memory_space<vmem>>, vector<8x10xf32>
    tpu.vector_store %arg6[%c0_13, %c0_14], %22 {strides = array<i32>} : memref<8x10xf32, #tpu.memory_space<vmem>>, vector<8x10xf32>,
    return
  }
  func.func @transform_0(%arg0: i32) -> (i32, i32) {
    %c0_i32 = arith.constant 0 : i32
    %c0_i32_0 = arith.constant 0 : i32
    return %arg0, %c0_i32 : i32, i32
  }
  func.func @transform_1(%arg0: i32) -> (i32, i32) {
    %c0_i32 = arith.constant 0 : i32
    %c0_i32_0 = arith.constant 0 : i32
    %c0_i32_1 = arith.constant 0 : i32
    return %c0_i32, %c0_i32_0 : i32, i32
  }
  func.func @transform_2(%arg0: i32) -> (i32, i32) {
    %c0_i32 = arith.constant 0 : i32
    %c0_i32_0 = arith.constant 0 : i32
    %c0_i32_1 = arith.constant 0 : i32
    return %c0_i32, %c0_i32_0 : i32, i32
  }
  func.func @transform_3(%arg0: i32) -> (i32, i32) {
    %c0_i32 = arith.constant 0 : i32
    %c0_i32_0 = arith.constant 0 : i32
    %c0_i32_1 = arith.constant 0 : i32
    return %c0_i32, %c0_i32_0 : i32, i32
  }
  func.func @transform_4(%arg0: i32) -> (i32, i32) {
    %c0_i32 = arith.constant 0 : i32
    %c0_i32_0 = arith.constant 0 : i32
    %c0_i32_1 = arith.constant 0 : i32
    return %c0_i32, %c0_i32_0 : i32, i32
  }
  func.func @transform_5(%arg0: i32) -> (i32, i32) {
    %c0_i32 = arith.constant 0 : i32
    %c0_i32_0 = arith.constant 0 : i32
    return %arg0, %c0_i32 : i32, i32
  }
}

</mosaic_0001>

<bundles_post_ra>
// kernel: tpu_custom_call.1
= control target key start
LH: loop header
LB: loop body
LE: loop exit
PB: predicated region body
PF: predicated region fallthrough
CT: control target
= control target key end

     0   :  { %10 = vsyncpa [#allocation3], 0  ;;  %s834_s0 = inlined_call_operand.hbm [shape: f32[24,32], index: 0, kind: input, shape index: {}]   ;;  %s835_s1 = inlined_call_operand.vmem [shape: f32[32,32], index: 1, kind: input, shape index: {}]   ;;  %s836_s2 = inlined_call_operand.vmem [shape: f32[1,32], index: 2, kind: input, shape index: {}]   ;;  %s837_s3 = inlined_call_operand.vmem [shape: f32[32,10], index: 3, kind: input, shape index: {}]   ;;  %s838_s4 = inlined_call_operand.vmem [shape: f32[1,10], index: 4, kind: input, shape index: {}]   ;;  %s839_s5 = inlined_call_operand.vmem [shape: f32[24,10], index: 5, kind: output, shape index: {}]  }
   0x1   :  { %12 = vsyncpa [#allocation3 + $0x1], 0  ;;  %s694_s18 = smov 0   ;;  %s696_s19 = smov 0  }
   0x2   :  { %s698_s20 = smov 0   ;;  %s700_s21 = smov 0  }
   0x3 LB: > { %s713_s22 = sadd.s32 4294967295, %s658_s21   ;;  %s716_s23 = sadd.s32 1, %s658_s21   ;;  %s658_s21 = sphi %s700_s21, %s847_s21   ;;  %s654_s20 = sphi %s698_s20, %s846_s20   ;;  %s650_s19 = sphi %s696_s19, %s845_s19   ;;  %s646_s18 = sphi %s694_s18, %s844_s18  }
   0x4   : > { %s22_s24 = ssub.s32 %s658_s21, %s716_s23  ;;  %s25_s25 = sadd.s32 1, %s654_s20 }
   0x5   : > { %p23_p0 = scmp.eq.s32.totalorder %s22_s24, 0  ;;  %p32_p1 = scmp.ne.s32.totalorder %s654_s20, %s650_s19 }
   0x6   : > { %p33_p2 = scmp.eq.s32.totalorder %s658_s21, 0  ;;  %p38_p3 = scmp.ne.s32.totalorder %s650_s19, %s646_s18 }
   0x7   : > { %s726_s26 = scalar_select %p23_p0, %s654_s20, %s25_s25  }
   0x8   : > { %p34_p4 = por %p33_p2, %p32_p1  ;;  %p39_p5 = scmp.eq.s32.totalorder %s713_s22, 0 }
   0x9   : > { %p554_p6 = scmp.lt.s32.totalorder %s658_s21, 3  ;;  %s184_s28 = sand.u32 1, %s654_s20  }
   0xa   : > { %p730_p7 = por %p39_p5, %p38_p3  ;;  %s493_s29 = sshll.u32 %s184_s28, 3 }
   0xb   : > { %s494_s30 = sshll.u32 %s658_s21, 7  ;;  %s188_s9 = scalar_lea.vmem [#allocation2], %s493_s29 }
   0xc   : > { %s739_s8 = scalar_lea.hbm %s834_s0, %s494_s30  ;;  %s195_s10 = sshll.u32 %s188_s9, 4  ;;  %s741_s10 = int_to_ptr.vmem [resolvable:$true] %s195_s10 }
   0xd   : > { %p743_p8 = pnand %p554_p6, %p34_p4  ;;  %s185_s12 = scalar_lea.sflag [#allocation3], %s184_s28 }
   0xe   : > { %s594_s13 = scalar_lea.hbm %s739_s8, 128  ;;  %s599_s16 = scalar_lea.hbm %s834_s0, 384 }
   0xf   : > { %p595_p11 = scmp.ne.s32.totalorder %s739_s8, %s594_s13  ;;  %p596_p12 = pneg %p743_p8 }
  0x10   : > { %p600_p1 = scmp.lt.u32.totalorder %s739_s8, %s834_s0  ;;  %p601_p2 = scmp.lt.u32.totalorder %s599_s16, %s594_s13 }
  0x11   : > { %p597_p13 = pnand %p596_p12, %p595_p11  ;;  %p603_p4 = scmp.lt.u32.totalorder %s594_s13, %s739_s8 }
  0x12   : > { %p602_p3 = por %p601_p2, %p600_p1 }
  0x13   : > { %p598_p0 = pneg %p597_p13 }
  0x14   : > { %p604_p5 = por %p603_p4, %p602_p3 }
  0x16   : > { %p605_p6 = pnand %p604_p5, %p598_p0 }
  0x18   : > { %608 = shalt.err (!%p605_p6)
}
  0x19   : > { %s609_s24 = scalar_lea.vmem %s741_s10, 128  ;;  %s660_s25 = smov [#allocation2]  }
  0x1a   : > { %p610_p11 = scmp.ne.s32.totalorder %s741_s10, %s609_s24  ;;  %s614_s28 = sshll.u32 %s660_s25, 4  ;;  %s615_s28 = int_to_ptr.vmem [resolvable:$false] %s614_s28 }
  0x1b   : > { %s616_s29 = scalar_lea.vmem %s615_s28, 256  ;;  %p617_p10 = scmp.lt.s32.totalorder %s741_s10, %s615_s28 }
  0x1c   : > { %p612_p13 = pnand %p610_p11, %p596_p12  ;;  %p618_p1 = scmp.lt.s32.totalorder %s616_s29, %s609_s24 }
  0x1e   : > { %p613_p9 = pneg %p612_p13  ;;  %p619_p2 = por %p618_p1, %p617_p10 }
  0x20   : > { %p620_p3 = pnand %p619_p2, %p613_p9 }
  0x22   : > { %623 = shalt.err (!%p620_p3)
}
  0x23   : > { %553 = dma.hbm_to_vmem [thread:$0]  (!%p743_p8), %s739_s8, 128, %s741_s10, %s185_s12  }
  0x24   : > { %p842_p0 = scmp.lt.s32.totalorder %s658_s21, 4  ;;  %p843_p4 = scmp.ge.s32.totalorder %s658_s21, 1 }
  0x26   : > { %p201_p12 = pnand %p843_p4, %p842_p0 }
  0x27   : > { %s206_s30 = sand.u32 (!%p201_p12), 1, %s650_s19  }
  0x28   : > { %204 = sbr.rel (%p201_p12) target bundleno = 805 (0x325), region = 40  ;;  %s496_s6 = sshll.u32 (!%p201_p12), %s206_s30, 3 }
  0x29   : > { %s207_s7 = scalar_lea.sflag (!%p201_p12), [#allocation3], %s206_s30  ;;  %s210_s9 = scalar_lea.vmem (!%p201_p12), [#allocation2], %s496_s6 }
  0x2f   : > { %641 = dma.done.wait (%p730_p7), %s207_s7, 128  }
  0x30   : > { %643 = vsyncadd (%p730_p7), %s207_s7, 4294967168  ;;  %v661_v0 = vmov 0.0|0.0   ;;  %vm662_vm0 = vmmov 0   ;;  %v663_v1 = vmov 0.0   ;;  %v241_v2 = vld [vmem:[%s835_s1] sm:$0xff]  ;;  %v242_v3 = vld [vmem:[%s835_s1 + $0x8] sm:$0xff] }
  0x31   : > { %536 = vmatprep.subr.bf16.mxu0 %v661_v0  ;;  %522 = vmatprep.mubr.msk.f32.mxu0 %vm662_vm0, %v663_v1  ;;  %v243_v4 = vld [vmem:[%s835_s1 + $0x10] sm:$0xff]  ;;  %v537_v5 = vpack.c.bf16 %v242_v3, %v241_v2  ;;  %v244_v6 = vld [vmem:[%s835_s1 + $0x18] sm:$0xff]  ;;  %v327_v7 = vld [vmem:[%s837_s3] sm:$0xff]  ;;  %vm252_vm1 = vcmask 261120   ;;  %vm411_vm2 = vcmask 80896   ;;  %p236_p7 = scmp.lt.s32.totalorder %s713_s22, 2 }
  0x32   : > { %542 = vmatprep.subr.bf16.mxu1 %v661_v0  ;;  %533 = vmatprep.mubr.msk.f32.mxu1 %vm662_vm0, %v663_v1  ;;  %v328_v8 = vld [vmem:[%s837_s3 + $0x8] sm:$0xff]  ;;  %v540_v9 = vpack.c.bf16 %v244_v6, %v243_v4  ;;  %v329_v12 = vld [vmem:[%s837_s3 + $0x10] sm:$0xff]  ;;  %v330_v13 = vld [vmem:[%s837_s3 + $0x18] sm:$0xff] }
  0x33   : > { %538 = vmatpush3.bf16.msra.mxu0 %v537_v5  ;;  %v543_v10 = vpack.c.bf16 %v328_v8, %v327_v7  ;;  %v240_v11 = vld [vmem:[%s210_s9] sm:$0xff]  ;;  %v546_v14 = vpack.c.bf16 %v330_v13, %v329_v12  ;;  %s849_s22 = smov (!%p236_p7, %s713_s22), 2 }
  0x34   : > { %539 = vmatprep.subr.bf16.mxu0 %v661_v0  ;;  %v498_v15 = vld [vmem:[%s836_s2] ss:$0 sm:$0xff]  ;;  %s497_s21 = sshll.u32 %s849_s22, 3 }
  0x35   : > { %544 = vmatpush3.bf16.msra.mxu1 %v543_v10  ;;  %v500_v20 = vld [vmem:[%s838_s4] ss:$0 sm:$0xff]  ;;  %s239_s11 = scalar_lea.vmem %s839_s5, %s497_s21 }
  0x36   : > { %545 = vmatprep.subr.bf16.mxu1 %v661_v0 }
  0x37   : > { %541 = vmatpush3.bf16.msra.mxu0 %v540_v9 }
  0x39   : > { %547 = vmatpush3.bf16.msra.mxu1 %v546_v14 }
  0x3a   : > { %523 = vmatmul.mubr.msk.f32.vlgmr.msra.gmra.mrb[0].mxu0 %vm252_vm1, %v240_v11 }
 0x10d   : > { %v322_v16 = vpop.f32.mrb[0].mxu0 }
 0x10e   : > { %v323_v17 = vadd.f32 %v498_v15, %v322_v16  ;;  %v524_v18 = vpop.f32.mrb[1].mxu0 }
 0x110   : > { %v326_v19 = vmax.f32 %v323_v17, 0.0 }
 0x112   : > { %534 = vmatmul.mubr.msk.f32.vlgmr.msra.gmra.mrb[0].mxu1 %vm252_vm1, %v326_v19 }
 0x1e5   : > { %v407_v21 = vpop.f32.mrb[0].mxu1 }
 0x1e6   : > { %v408_v22 = vadd.f32 %v500_v20, %v407_v21  ;;  %v535_v23 = vpop.f32.mrb[1].mxu1 }
 0x1e8   : > { %v412_v24 = vsel %vm411_vm2, %v408_v22, -inf }
 0x1e9   : > { %413 = vmax.xlane.f32.xlu0 %v412_v24 }
 0x276   : > { %v414_v25 = vpop.xlane.xlu0 %413 }
 0x277   : > { %v415_v26 = vsub.f32 %v408_v22, %v414_v25 }
 0x279   : > { %v416_v27 = vmul.f32 1.442695, %v415_v26 }
 0x27b   : > { %590 = vpow2.f32 %v416_v27 }
 0x285   : > { %v591_v28 = vpop.eup %590 }
 0x286   : > { %v418_v29 = vsel %vm411_vm2, %v591_v28, 0.0 }
 0x287   : > { %419 = vadd.xlane.f32.xlu0 %v418_v29 }
 0x314   : > { %v420_v30 = vpop.xlane.xlu0 %419 }
 0x315   : > { %592 = vlog2.f32 %v420_v30 }
 0x31f   : > { %v593_v31 = vpop.eup %592 }
 0x320   : > { %v422_v32 = vmul.f32 0.6931472, %v593_v31 }
 0x322   : > { %v423_v33 = vsub.f32 %v415_v26, %v422_v32 }
 0x324   : > { %424 = vst.msk [vmem:[%s239_s11] sm:$0xff] %vm411_vm2, %v423_v33 }
 0x325 PF: > { %p15_p8 = scmp.ge.s32.totalorder %s716_s23, 5   ;;  %s844_s18 = smov %s650_s19 }
 0x326   : > { %s845_s19 = smov %s654_s20  ;;  %s846_s20 = smov %s726_s26 }
 0x327   : > { %s847_s21 = smov %s716_s23  ;;  %17 = sbr.rel (!%p15_p8) target bundleno = 3 (0x3), region = 80 }
 0x32e   :  { %444 = vsyncpa [#allocation3], 1 }
 0x32f   :  { %446 = vsyncpa [#allocation3 + $0x1], 1 }

</bundles_post_ra>
